<compile_context>
chip_gen: v7x
topology: tpu7x:2x2x1
jax: 0.10.0
libtpu: 0.0.40
codegen_flags: <defaults>
</compile_context>

<pallas_src>
import functools
import numpy as np
import jax
import jax.numpy as jnp
from jax.experimental import pallas as pl
from jax.experimental.pallas import tpu as pltpu

_HALO = 128  # lane-aligned halo on each side of the padded-activation scratch


def _conv1d_block_kernel(x_ref, w_ref, p_ref, gmat_ref, o_ref, xpad_ref, col_ref,
                         *, Cin, Cout, K, L, Lp, pad, group_size, mish, eps):
    # x_ref:    (Bt, Cin, Lp)    activations (NCL-native, L padded to 128-multiple)
    # w_ref:    (Cout, K*Cin)    conv weight, im2col layout (resident)
    # p_ref:    (Cout, 3)        [conv bias | GN gamma | GN beta]
    # gmat_ref: (Cout, Cout)     same-group indicator (1.0 iff channels share a group)
    # o_ref:    (Bt, Cout, Lp)
    # xpad_ref: (Cin, Lp+2*HALO) zero-halo padded activation scratch (persistent VMEM)
    # col_ref:  (K*Cin, Lp)      im2col operand scratch (persistent VMEM)
    bt = x_ref.shape[0]
    cdt = xpad_ref.dtype
    inv_cnt = np.float32(1.0 / (group_size * L))

    # Zero the halo lanes every grid step (cheap, lane-aligned 128-wide strips) so the
    # kernel is correct even when the batch grid is sharded across TensorCores.
    xpad_ref[:, :_HALO] = jnp.zeros((Cin, _HALO), cdt)
    xpad_ref[:, _HALO + Lp:] = jnp.zeros((Cin, _HALO), cdt)

    w = w_ref[...]                                 # (Cout, K*Cin)
    params = p_ref[...].astype(jnp.float32)        # (Cout, 3)
    bias, gamma, beta = params[:, 0:1], params[:, 1:2], params[:, 2:3]
    gmat = gmat_ref[...]                           # (Cout, Cout), f32

    for b in range(bt):                            # small static batch tile
        # ---- build im2col: one aligned bulk copy + K static lane-offset slices ----
        xpad_ref[:, _HALO:_HALO + Lp] = x_ref[b].astype(cdt)
        for k in range(K):
            start = _HALO - pad + k
            col_ref[k * Cin:(k + 1) * Cin, :] = xpad_ref[:, start:start + Lp]

        # ---- Conv1d as ONE MXU matmul, f32 accumulation ----
        y = jnp.dot(w, col_ref[...], preferred_element_type=jnp.float32)   # (Cout, Lp)
        y = y + bias

        # ---- GroupNorm: lane reduction first, then tiny exact group aggregation ----
        if Lp != L:
            lane = jax.lax.broadcasted_iota(jnp.int32, (Cout, Lp), 1)
            ym = jnp.where(lane < L, y, 0.0)       # keep padded lanes out of the stats
        else:
            ym = y
        st = jnp.concatenate(
            [jnp.sum(ym, axis=1, keepdims=True),
             jnp.sum(ym * ym, axis=1, keepdims=True)], axis=1)             # (Cout, 2)
        grp = jnp.dot(gmat, st, preferred_element_type=jnp.float32,
                      precision=jax.lax.Precision.HIGHEST)                 # (Cout, 2)
        mean = grp[:, 0:1] * inv_cnt
        var = jnp.maximum(grp[:, 1:2] * inv_cnt - mean * mean, 0.0)
        inv_std = jax.lax.rsqrt(var + np.float32(eps))
        scale = gamma * inv_std                    # fold GN affine into scale/shift
        shift = beta - mean * scale
        y = y * scale + shift

        # ---- Activation: one exp + one approx reciprocal ----
        t = jnp.exp(-jnp.abs(y))
        if mish:
            # mish(y) = y * tanh(softplus(y)) = y * (z^2-1)/(z^2+1),  z = 1 + e^y
            num = jnp.where(y >= 0.0, 1.0 + 2.0 * t, t * (2.0 + t))
            den = jnp.where(y >= 0.0, 1.0 + 2.0 * t + 2.0 * t * t, 2.0 + t * (2.0 + t))
        else:
            # silu(y) = y * sigmoid(y)
            num = jnp.where(y >= 0.0, 1.0, t)
            den = 1.0 + t
        o_ref[b] = (y * num * pl.reciprocal(den, approx=True)).astype(o_ref.dtype)


def conv1d_block(x, weight, bias, gamma, beta, *, n_groups=8, mish=True,
                 batch_tile=1, eps=1e-5):
    """x: (B, Cin, L); weight: (Cout, Cin, K) [PyTorch Conv1d layout];
    bias/gamma/beta: (Cout,). Returns (B, Cout, L)."""
    B, Cin, L = x.shape
    Cout, Cin_w, K = weight.shape
    assert Cin_w == Cin
    assert K % 2 == 1, "only odd kernel_size (same-length output) implemented"
    assert Cout % n_groups == 0
    group_size = Cout // n_groups
    pad = K // 2

    # Lane-dense length: pad L up to a multiple of 128 (masked out of GN stats).
    Lp = ((L + 127) // 128) * 128
    x_p = x if Lp == L else jnp.pad(x, ((0, 0), (0, 0), (0, Lp - L)))

    # Batch tile amortizes per-grid-step overhead; must divide B.
    Bt = max(d for d in range(1, min(batch_tile, B) + 1) if B % d == 0)

    # bf16 matmul operands when the im2col row blocks stay sublane-tile aligned
    # (bf16 sublane tile = 16); otherwise f32 operands (MXU default precision is a
    # single bf16 pass anyway), which keeps layouts robust for any Cin.
    cdt = jnp.bfloat16 if Cin % 16 == 0 else jnp.float32

    # Conv weight -> im2col layout (Cout, K*Cin): W2[o, k*Cin + c] = weight[o, c, k].
    w2 = jnp.transpose(weight, (0, 2, 1)).reshape(Cout, K * Cin).astype(cdt)
    # bias/gamma/beta fused into one small side input.
    params = jnp.stack([bias, gamma, beta], axis=1).astype(jnp.float32)
    # Same-group indicator for the tiny stats aggregation matmul.
    gid = np.arange(Cout) // group_size
    gmat = jnp.asarray((gid[:, None] == gid[None, :]).astype(np.float32))

    kernel = functools.partial(
        _conv1d_block_kernel, Cin=Cin, Cout=Cout, K=K, L=L, Lp=Lp, pad=pad,
        group_size=group_size, mish=mish, eps=eps)

    out = pl.pallas_call(
        kernel,
        out_shape=jax.ShapeDtypeStruct((B, Cout, Lp), x.dtype),
        grid=(B // Bt,),
        in_specs=[
            pl.BlockSpec((Bt, Cin, Lp), lambda i: (i, 0, 0)),    # activations
            pl.BlockSpec((Cout, K * Cin), lambda i: (0, 0)),     # conv weight (resident)
            pl.BlockSpec((Cout, 3), lambda i: (0, 0)),           # bias|gamma|beta
            pl.BlockSpec((Cout, Cout), lambda i: (0, 0)),        # group indicator
        ],
        out_specs=pl.BlockSpec((Bt, Cout, Lp), lambda i: (i, 0, 0)),
        scratch_shapes=[
            pltpu.VMEM((Cin, Lp + 2 * _HALO), cdt),              # zero-halo padded x
            pltpu.VMEM((K * Cin, Lp), cdt),                      # im2col operand
        ],
        compiler_params=pltpu.CompilerParams(
            dimension_semantics=("parallel",)),
    )(x_p, w2, params, gmat)
    return out if Lp == L else out[:, :, :L]


def ref_conv1d_block(x, w, b, gamma, beta, n_groups, mish=True, eps=1e-5):
    """Numpy (float64) reference of Conv1d(pad=K//2) -> GroupNorm -> Mish/SiLU."""
    x = np.asarray(x, np.float64)
    w = np.asarray(w, np.float64)
    b = np.asarray(b, np.float64)
    gamma = np.asarray(gamma, np.float64)
    beta = np.asarray(beta, np.float64)
    B, Cin, L = x.shape
    Cout, _, K = w.shape
    pad = K // 2
    xp = np.pad(x, ((0, 0), (0, 0), (pad, pad)))
    y = np.zeros((B, Cout, L), np.float64)
    for k in range(K):
        y += np.einsum("oc,bcl->bol", w[:, :, k], xp[:, :, k:k + L])
    y += b[None, :, None]
    gs = Cout // n_groups
    yg = y.reshape(B, n_groups, gs, L)
    mean = yg.mean(axis=(2, 3), keepdims=True)
    var = yg.var(axis=(2, 3), keepdims=True)
    yn = ((yg - mean) / np.sqrt(var + eps)).reshape(B, Cout, L)
    yn = yn * gamma[None, :, None] + beta[None, :, None]
    if mish:
        sp = np.maximum(yn, 0.0) + np.log1p(np.exp(-np.abs(yn)))
        return yn * np.tanh(sp)
    return yn / (1.0 + np.exp(-yn))


if __name__ == "__main__":
    keys = jax.random.split(jax.random.PRNGKey(0), 10)

    # Case 1: Mish, lane-dense L, bf16 matmul operands (Cin % 16 == 0), grid over batch.
    B, Cin, Cout, L, K, ng = 2, 16, 32, 128, 5, 8
    x = jax.random.normal(keys[0], (B, Cin, L), dtype=jnp.float32)
    w = jax.random.normal(keys[1], (Cout, Cin, K), dtype=jnp.float32) * 0.1
    b = jax.random.normal(keys[2], (Cout,), dtype=jnp.float32) * 0.1
    g = 1.0 + 0.1 * jax.random.normal(keys[3], (Cout,), dtype=jnp.float32)
    be = 0.1 * jax.random.normal(keys[4], (Cout,), dtype=jnp.float32)
    y = jax.block_until_ready(
        conv1d_block(x, w, b, g, be, n_groups=ng, mish=True, batch_tile=1))
    assert y.shape == (B, Cout, L), y.shape
    np.testing.assert_allclose(
        np.asarray(y), ref_conv1d_block(x, w, b, g, be, ng, mish=True),
        rtol=2e-2, atol=2e-2)

    # Case 2: SiLU branch, ragged L (mask path), batch_tile=2, f32 operand fallback.
    B2, Cin2, Cout2, L2, K2, ng2 = 4, 8, 16, 100, 3, 8
    x2 = jax.random.normal(keys[5], (B2, Cin2, L2), dtype=jnp.float32)
    w2 = jax.random.normal(keys[6], (Cout2, Cin2, K2), dtype=jnp.float32) * 0.1
    b2 = jax.random.normal(keys[7], (Cout2,), dtype=jnp.float32) * 0.1
    g2 = 1.0 + 0.1 * jax.random.normal(keys[8], (Cout2,), dtype=jnp.float32)
    be2 = 0.1 * jax.random.normal(keys[9], (Cout2,), dtype=jnp.float32)
    y2 = jax.block_until_ready(
        conv1d_block(x2, w2, b2, g2, be2, n_groups=ng2, mish=False, batch_tile=2))
    assert y2.shape == (B2, Cout2, L2), y2.shape
    np.testing.assert_allclose(
        np.asarray(y2), ref_conv1d_block(x2, w2, b2, g2, be2, ng2, mish=False),
        rtol=2e-2, atol=2e-2)

    print("KERNEL_OK")
</pallas_src>

<mosaic_0001>
module attributes {stable_mosaic.version = 11 : i64} {
  func.func @_conv1d_block_kernel(%arg0: i32, %arg1: memref<1x16x128xf32, #tpu.memory_space<vmem>>, %arg2: memref<32x80xbf16, #tpu.memory_space<vmem>>, %arg3: memref<32x3xf32, #tpu.memory_space<vmem>>, %arg4: memref<32x32xf32, #tpu.memory_space<vmem>>, %arg5: memref<1x32x128xf32, #tpu.memory_space<vmem>>, %arg6: memref<16x384xbf16, #tpu.memory_space<vmem>>, %arg7: memref<80x128xbf16, #tpu.memory_space<vmem>>) attributes {dimension_semantics = [#tpu.dimension_semantics<parallel>], iteration_bounds = array<i64: 2>, scalar_prefetch = 0 : i64, scratch_operands = 2 : i64, tpu.core_type = #tpu.core_type<tc>, window_params = [{transform_indices = @transform_0, window_bounds = array<i64: 1, 16, 128>}, {pipeline_mode = #tpu.pipeline_mode<synchronous>, transform_indices = @transform_1, window_bounds = array<i64: 32, 80>}, {pipeline_mode = #tpu.pipeline_mode<synchronous>, transform_indices = @transform_2, window_bounds = array<i64: 32, 3>}, {pipeline_mode = #tpu.pipeline_mode<synchronous>, transform_indices = @transform_3, window_bounds = array<i64: 32, 32>}, {transform_indices = @transform_4, window_bounds = array<i64: 1, 32, 128>}]} {
    %cst = arith.constant 0.000000e+00 : bf16
    %0 = vector.broadcast %cst : bf16 to vector<16x128xbf16>
    %c0 = arith.constant 0 : index
    %c0_0 = arith.constant 0 : index
    %1 = vector.load %arg6[%c0, %c0_0] : memref<16x384xbf16, #tpu.memory_space<vmem>>, vector<16x128xbf16>
    tpu.vector_store %arg6[%c0, %c0_0], %0 {strides = array<i32>} : memref<16x384xbf16, #tpu.memory_space<vmem>>, vector<16x128xbf16>,
    %cst_1 = arith.constant 0.000000e+00 : bf16
    %2 = vector.broadcast %cst_1 : bf16 to vector<16x128xbf16>
    %c0_2 = arith.constant 0 : index
    %c256 = arith.constant 256 : index
    %3 = vector.load %arg6[%c0_2, %c256] : memref<16x384xbf16, #tpu.memory_space<vmem>>, vector<16x128xbf16>
    tpu.vector_store %arg6[%c0_2, %c256], %2 {strides = array<i32>} : memref<16x384xbf16, #tpu.memory_space<vmem>>, vector<16x128xbf16>,
    %c0_3 = arith.constant 0 : index
    %c0_4 = arith.constant 0 : index
    %4 = vector.load %arg2[%c0_3, %c0_4] : memref<32x80xbf16, #tpu.memory_space<vmem>>, vector<32x80xbf16>
    %c0_5 = arith.constant 0 : index
    %c0_6 = arith.constant 0 : index
    %5 = vector.load %arg3[%c0_5, %c0_6] : memref<32x3xf32, #tpu.memory_space<vmem>>, vector<32x3xf32>
    %6 = vector.extract_strided_slice %5 {offsets = [0, 0], sizes = [32, 1], strides = [1, 1]} : vector<32x3xf32> to vector<32x1xf32>
    %7 = vector.extract_strided_slice %5 {offsets = [0, 1], sizes = [32, 1], strides = [1, 1]} : vector<32x3xf32> to vector<32x1xf32>
    %8 = vector.extract_strided_slice %5 {offsets = [0, 2], sizes = [32, 1], strides = [1, 1]} : vector<32x3xf32> to vector<32x1xf32>
    %c0_7 = arith.constant 0 : index
    %c0_8 = arith.constant 0 : index
    %9 = vector.load %arg4[%c0_7, %c0_8] : memref<32x32xf32, #tpu.memory_space<vmem>>, vector<32x32xf32>
    %c0_9 = arith.constant 0 : index
    %c0_10 = arith.constant 0 : index
    %c0_11 = arith.constant 0 : index
    %10 = vector.load %arg1[%c0_9, %c0_10, %c0_11] : memref<1x16x128xf32, #tpu.memory_space<vmem>>, vector<1x16x128xf32>
    %11 = vector.shape_cast %10 : vector<1x16x128xf32> to vector<16x128xf32>
    %12 = arith.truncf %11 : vector<16x128xf32> to vector<16x128xbf16>
    %c0_12 = arith.constant 0 : index
    %c128 = arith.constant 128 : index
    %13 = vector.load %arg6[%c0_12, %c128] : memref<16x384xbf16, #tpu.memory_space<vmem>>, vector<16x128xbf16>
    tpu.vector_store %arg6[%c0_12, %c128], %12 {strides = array<i32>} : memref<16x384xbf16, #tpu.memory_space<vmem>>, vector<16x128xbf16>,
    %c0_13 = arith.constant 0 : index
    %c126 = arith.constant 126 : index
    %14 = vector.load %arg6[%c0_13, %c126] : memref<16x384xbf16, #tpu.memory_space<vmem>>, vector<16x128xbf16>
    %c0_14 = arith.constant 0 : index
    %c0_15 = arith.constant 0 : index
    %15 = vector.load %arg7[%c0_14, %c0_15] : memref<80x128xbf16, #tpu.memory_space<vmem>>, vector<16x128xbf16>
    tpu.vector_store %arg7[%c0_14, %c0_15], %14 {strides = array<i32>} : memref<80x128xbf16, #tpu.memory_space<vmem>>, vector<16x128xbf16>,
    %c0_16 = arith.constant 0 : index
    %c127 = arith.constant 127 : index
    %16 = vector.load %arg6[%c0_16, %c127] : memref<16x384xbf16, #tpu.memory_space<vmem>>, vector<16x128xbf16>
    %c16 = arith.constant 16 : index
    %c0_17 = arith.constant 0 : index
    %17 = vector.load %arg7[%c16, %c0_17] : memref<80x128xbf16, #tpu.memory_space<vmem>>, vector<16x128xbf16>
    tpu.vector_store %arg7[%c16, %c0_17], %16 {strides = array<i32>} : memref<80x128xbf16, #tpu.memory_space<vmem>>, vector<16x128xbf16>,
    %c0_18 = arith.constant 0 : index
    %c128_19 = arith.constant 128 : index
    %18 = vector.load %arg6[%c0_18, %c128_19] : memref<16x384xbf16, #tpu.memory_space<vmem>>, vector<16x128xbf16>
    %c32 = arith.constant 32 : index
    %c0_20 = arith.constant 0 : index
    %19 = vector.load %arg7[%c32, %c0_20] : memref<80x128xbf16, #tpu.memory_space<vmem>>, vector<16x128xbf16>
    tpu.vector_store %arg7[%c32, %c0_20], %18 {strides = array<i32>} : memref<80x128xbf16, #tpu.memory_space<vmem>>, vector<16x128xbf16>,
    %c0_21 = arith.constant 0 : index
    %c129 = arith.constant 129 : index
    %20 = vector.load %arg6[%c0_21, %c129] : memref<16x384xbf16, #tpu.memory_space<vmem>>, vector<16x128xbf16>
    %c48 = arith.constant 48 : index
    %c0_22 = arith.constant 0 : index
    %21 = vector.load %arg7[%c48, %c0_22] : memref<80x128xbf16, #tpu.memory_space<vmem>>, vector<16x128xbf16>
    tpu.vector_store %arg7[%c48, %c0_22], %20 {strides = array<i32>} : memref<80x128xbf16, #tpu.memory_space<vmem>>, vector<16x128xbf16>,
    %c0_23 = arith.constant 0 : index
    %c130 = arith.constant 130 : index
    %22 = vector.load %arg6[%c0_23, %c130] : memref<16x384xbf16, #tpu.memory_space<vmem>>, vector<16x128xbf16>
    %c64 = arith.constant 64 : index
    %c0_24 = arith.constant 0 : index
    %23 = vector.load %arg7[%c64, %c0_24] : memref<80x128xbf16, #tpu.memory_space<vmem>>, vector<16x128xbf16>
    tpu.vector_store %arg7[%c64, %c0_24], %22 {strides = array<i32>} : memref<80x128xbf16, #tpu.memory_space<vmem>>, vector<16x128xbf16>,
    %c0_25 = arith.constant 0 : index
    %c0_26 = arith.constant 0 : index
    %24 = vector.load %arg7[%c0_25, %c0_26] : memref<80x128xbf16, #tpu.memory_space<vmem>>, vector<80x128xbf16>
    %cst_27 = arith.constant dense<0.000000e+00> : vector<32x128xf32>
    %25 = tpu.matmul %4, %24, %cst_27 {dimension_numbers = #tpu.dot_dimension_numbers<[1], [0], [0], [1], [0, 0, 1, 1], [], []>} : vector<32x80xbf16>, vector<80x128xbf16>, vector<32x128xf32> -> vector<32x128xf32>
    %26 = vector.broadcast %6 : vector<32x1xf32> to vector<32x128xf32>
    %27 = arith.addf %25, %26 : vector<32x128xf32>
    %cst_28 = arith.constant dense<0.000000e+00> : vector<32xf32>
    %28 = vector.multi_reduction <add>, %27, %cst_28 [1] : vector<32x128xf32> to vector<32xf32>
    %29 = vector.shape_cast %28 : vector<32xf32> to vector<32x1xf32>
    %30 = arith.mulf %27, %27 : vector<32x128xf32>
    %cst_29 = arith.constant dense<0.000000e+00> : vector<32xf32>
    %31 = vector.multi_reduction <add>, %30, %cst_29 [1] : vector<32x128xf32> to vector<32xf32>
    %32 = vector.shape_cast %31 : vector<32xf32> to vector<32x1xf32>
    %33 = tpu.concatenate %29, %32 in 1 : vector<32x1xf32>, vector<32x1xf32> -> vector<32x2xf32>
    %cst_30 = arith.constant dense<0.000000e+00> : vector<32x2xf32>
    %34 = tpu.matmul %9, %33, %cst_30 {dimension_numbers = #tpu.dot_dimension_numbers<[1], [0], [0], [1], [0, 0, 1, 1], [], []>, precision = #tpu.contract_precision<fp32>} : vector<32x32xf32>, vector<32x2xf32>, vector<32x2xf32> -> vector<32x2xf32>
    %35 = vector.extract_strided_slice %34 {offsets = [0, 0], sizes = [32, 1], strides = [1, 1]} : vector<32x2xf32> to vector<32x1xf32>
    %cst_31 = arith.constant 0.001953125 : f32
    %36 = vector.broadcast %cst_31 : f32 to vector<32x1xf32>
    %37 = arith.mulf %35, %36 : vector<32x1xf32>
    %38 = vector.extract_strided_slice %34 {offsets = [0, 1], sizes = [32, 1], strides = [1, 1]} : vector<32x2xf32> to vector<32x1xf32>
    %cst_32 = arith.constant 0.001953125 : f32
    %39 = vector.broadcast %cst_32 : f32 to vector<32x1xf32>
    %40 = arith.mulf %38, %39 : vector<32x1xf32>
    %41 = arith.mulf %37, %37 : vector<32x1xf32>
    %42 = arith.subf %40, %41 : vector<32x1xf32>
    %cst_33 = arith.constant 0.000000e+00 : f32
    %43 = vector.broadcast %cst_33 : f32 to vector<32x1xf32>
    %44 = arith.maximumf %42, %43 : vector<32x1xf32>
    %cst_34 = arith.constant 9.99999974E-6 : f32
    %45 = vector.broadcast %cst_34 : f32 to vector<32x1xf32>
    %46 = arith.addf %44, %45 : vector<32x1xf32>
    %47 = math.rsqrt %46 : vector<32x1xf32>
    %48 = arith.mulf %7, %47 : vector<32x1xf32>
    %49 = arith.mulf %37, %48 : vector<32x1xf32>
    %50 = arith.subf %8, %49 : vector<32x1xf32>
    %51 = vector.broadcast %48 : vector<32x1xf32> to vector<32x128xf32>
    %52 = arith.mulf %27, %51 : vector<32x128xf32>
    %53 = vector.broadcast %50 : vector<32x1xf32> to vector<32x128xf32>
    %54 = arith.addf %52, %53 : vector<32x128xf32>
    %55 = math.absf %54 : vector<32x128xf32>
    %cst_35 = arith.constant 0.000000e+00 : f32
    %56 = vector.broadcast %cst_35 : f32 to vector<32x128xf32>
    %57 = arith.subf %56, %55 : vector<32x128xf32>
    %58 = math.exp %57 : vector<32x128xf32>
    %cst_36 = arith.constant 0.000000e+00 : f32
    %59 = vector.broadcast %cst_36 : f32 to vector<32x128xf32>
    %60 = arith.cmpf oge, %54, %59 : vector<32x128xf32>
    %cst_37 = arith.constant 2.000000e+00 : f32
    %61 = vector.broadcast %cst_37 : f32 to vector<32x128xf32>
    %62 = arith.mulf %61, %58 : vector<32x128xf32>
    %cst_38 = arith.constant 1.000000e+00 : f32
    %63 = vector.broadcast %cst_38 : f32 to vector<32x128xf32>
    %64 = arith.addf %63, %62 : vector<32x128xf32>
    %cst_39 = arith.constant 2.000000e+00 : f32
    %65 = vector.broadcast %cst_39 : f32 to vector<32x128xf32>
    %66 = arith.addf %65, %58 : vector<32x128xf32>
    %67 = arith.mulf %58, %66 : vector<32x128xf32>
    %68 = arith.select %60, %64, %67 : vector<32x128xi1>, vector<32x128xf32>
    %cst_40 = arith.constant 0.000000e+00 : f32
    %69 = vector.broadcast %cst_40 : f32 to vector<32x128xf32>
    %70 = arith.cmpf oge, %54, %69 : vector<32x128xf32>
    %cst_41 = arith.constant 2.000000e+00 : f32
    %71 = vector.broadcast %cst_41 : f32 to vector<32x128xf32>
    %72 = arith.mulf %71, %58 : vector<32x128xf32>
    %cst_42 = arith.constant 1.000000e+00 : f32
    %73 = vector.broadcast %cst_42 : f32 to vector<32x128xf32>
    %74 = arith.addf %73, %72 : vector<32x128xf32>
    %cst_43 = arith.constant 2.000000e+00 : f32
    %75 = vector.broadcast %cst_43 : f32 to vector<32x128xf32>
    %76 = arith.mulf %75, %58 : vector<32x128xf32>
    %77 = arith.mulf %76, %58 : vector<32x128xf32>
    %78 = arith.addf %74, %77 : vector<32x128xf32>
    %cst_44 = arith.constant 2.000000e+00 : f32
    %79 = vector.broadcast %cst_44 : f32 to vector<32x128xf32>
    %80 = arith.addf %79, %58 : vector<32x128xf32>
    %81 = arith.mulf %58, %80 : vector<32x128xf32>
    %cst_45 = arith.constant 2.000000e+00 : f32
    %82 = vector.broadcast %cst_45 : f32 to vector<32x128xf32>
    %83 = arith.addf %82, %81 : vector<32x128xf32>
    %84 = arith.select %70, %78, %83 : vector<32x128xi1>, vector<32x128xf32>
    %85 = arith.mulf %54, %68 : vector<32x128xf32>
    %86 = tpu.reciprocal %84 {approx = true} : vector<32x128xf32> -> vector<32x128xf32>
    %87 = arith.mulf %85, %86 : vector<32x128xf32>
    %c0_46 = arith.constant 0 : index
    %c0_47 = arith.constant 0 : index
    %c0_48 = arith.constant 0 : index
    %88 = vector.load %arg5[%c0_46, %c0_47, %c0_48] : memref<1x32x128xf32, #tpu.memory_space<vmem>>, vector<1x32x128xf32>
    %89 = vector.shape_cast %88 : vector<1x32x128xf32> to vector<32x128xf32>
    %90 = vector.shape_cast %87 : vector<32x128xf32> to vector<1x32x128xf32>
    tpu.vector_store %arg5[%c0_46, %c0_47, %c0_48], %90 {strides = array<i32>} : memref<1x32x128xf32, #tpu.memory_space<vmem>>, vector<1x32x128xf32>,
    return
  }
  func.func @transform_0(%arg0: i32) -> (i32, i32, i32) {
    %c0_i32 = arith.constant 0 : i32
    %c0_i32_0 = arith.constant 0 : i32
    %c0_i32_1 = arith.constant 0 : i32
    return %arg0, %c0_i32, %c0_i32_0 : i32, i32, i32
  }
  func.func @transform_1(%arg0: i32) -> (i32, i32) {
    %c0_i32 = arith.constant 0 : i32
    %c0_i32_0 = arith.constant 0 : i32
    %c0_i32_1 = arith.constant 0 : i32
    return %c0_i32, %c0_i32_0 : i32, i32
  }
  func.func @transform_2(%arg0: i32) -> (i32, i32) {
    %c0_i32 = arith.constant 0 : i32
    %c0_i32_0 = arith.constant 0 : i32
    %c0_i32_1 = arith.constant 0 : i32
    return %c0_i32, %c0_i32_0 : i32, i32
  }
  func.func @transform_3(%arg0: i32) -> (i32, i32) {
    %c0_i32 = arith.constant 0 : i32
    %c0_i32_0 = arith.constant 0 : i32
    %c0_i32_1 = arith.constant 0 : i32
    return %c0_i32, %c0_i32_0 : i32, i32
  }
  func.func @transform_4(%arg0: i32) -> (i32, i32, i32) {
    %c0_i32 = arith.constant 0 : i32
    %c0_i32_0 = arith.constant 0 : i32
    %c0_i32_1 = arith.constant 0 : i32
    return %arg0, %c0_i32, %c0_i32_0 : i32, i32, i32
  }
}

</mosaic_0001>

<bundles_post_ra>
// kernel: tpu_custom_call.1
= control target key start
LH: loop header
LB: loop body
LE: loop exit
PB: predicated region body
PF: predicated region fallthrough
CT: control target
= control target key end

     0   :  { %9 = vsyncpa [#allocation5], 0  ;;  %s2204_s0 = inlined_call_operand.vmem [shape: f32[2,16,128], index: 0, kind: input, shape index: {}]   ;;  %s2205_s1 = inlined_call_operand.hbm [shape: bf16[32,80], index: 1, kind: input, shape index: {}]   ;;  %s2206_s2 = inlined_call_operand.vmem [shape: f32[32,3], index: 2, kind: input, shape index: {}]   ;;  %s2207_s3 = inlined_call_operand.hbm [shape: f32[32,32], index: 3, kind: input, shape index: {}]   ;;  %s2208_s4 = inlined_call_operand.hbm [shape: f32[2,32,128], index: 4, kind: output, shape index: {}]  }
   0x1   :  { %10 = vsyncpa [#allocation8], 0 }
   0x2   :  { %11 = vsyncpa [#allocation6], 0 }
   0x3   :  { %13 = vsyncpa [#allocation6 + $0x1], 0  ;;  %s1853_s15 = smov 0   ;;  %s1855_s16 = smov 0  }
   0x4   :  { %s1857_s17 = smov 0   ;;  %s1859_s18 = smov 0  }
   0x5 LB: > { %s1874_s19 = sadd.s32 4294967295, %s1810_s18   ;;  %s1336_s20 = sadd.s32 4294967294, %s1810_s18   ;;  %s1810_s18 = sphi %s1859_s18, %s2226_s18   ;;  %s1806_s17 = sphi %s1857_s17, %s2225_s17   ;;  %s1802_s16 = sphi %s1855_s16, %s2224_s16   ;;  %s1798_s15 = sphi %s1853_s15, %s2223_s15  }
   0x6   : > { %s1878_s21 = sadd.s32 1, %s1810_s18   ;;  %s115_s22 = sadd.s32 1, %s1806_s17 }
   0x7   : > { %s112_s23 = ssub.s32 %s1810_s18, %s1878_s21  ;;  %p125_p0 = scmp.ne.s32.totalorder %s1806_s17, %s1802_s16 }
   0x8   : > { %p113_p1 = scmp.eq.s32.totalorder %s112_s23, 0  ;;  %p126_p2 = scmp.eq.s32.totalorder %s1874_s19, 1 }
   0x9   : > { %p131_p3 = scmp.ne.s32.totalorder %s1802_s16, %s1798_s15  ;;  %p132_p4 = scmp.eq.s32.totalorder %s1336_s20, 1 }
   0xa   : > { %s1889_s24 = scalar_select %p113_p1, %s1806_s17, %s115_s22  }
   0xb   : > { %p1891_p5 = por %p126_p2, %p125_p0  ;;  %p1895_p6 = por %p132_p4, %p131_p3 }
   0xc   : > { %p1337_p7 = scmp.ge.s32.totalorder %s1810_s18, 1  ;;  %p139_p8 = scmp.lt.s32.totalorder %s1810_s18, 3 }
   0xd   : > { %s2212_s25 = scalar_select %p1891_p5, 1, 0 }
   0xe   : > { %s2213_s26 = scalar_select %p1895_p6, 1, 0 }
   0xf   : > { %p2209_p9 = scmp.eq.s32.totalorder %s1874_s19, 0  ;;  %p1902_p10 = pnand %p1337_p7, %p139_p8 }
  0x10   : > { %s1812_s28 = smov [#allocation4]   ;;  %s1813_s5 = smov [#allocation7]  }
  0x11   : > { %s2214_s27 = scalar_select %p1902_p10, 1, 0 }
  0x12   : > { %s151_s29 = sshll.u32 %s1812_s28, 4  ;;  %p1589_p11 = pneg %p1902_p10  ;;  %s152_s29 = int_to_ptr.vmem [resolvable:$true] %s151_s29 }
  0x13   : > { %s167_s6 = sshll.u32 %s1813_s5, 4  ;;  %s1684_s9 = scalar_lea.hbm %s2205_s1, 256  ;;  %s1914_s6 = int_to_ptr.vmem [resolvable:$true] %s167_s6 }
  0x14   : > { %p1910_p12 = pnand %p2209_p9, %p1589_p11  ;;  %p1685_p13 = scmp.ne.s32.totalorder %s2205_s1, %s1684_s9 }
  0x15   : > { %p1691_p3 = scmp.lt.u32.totalorder %s1684_s9, %s2205_s1 }
  0x16   : > { %p1686_p0 = pneg %p1910_p12 }
  0x18   : > { %p1687_p1 = pnand %p1686_p0, %p1685_p13 }
  0x1a   : > { %p1688_p2 = pneg %p1687_p1 }
  0x1c   : > { %p1693_p4 = pnand %p1691_p3, %p1688_p2 }
  0x1e   : > { %1696 = shalt.err (!%p1693_p4)
}
  0x1f   : > { %s1697_s14 = scalar_lea.vmem %s152_s29, 256  ;;  %p1705_p9 = scmp.lt.s32.totalorder %s152_s29, %s152_s29 }
  0x20   : > { %p1698_p7 = scmp.ne.s32.totalorder %s152_s29, %s1697_s14  ;;  %p1706_p6 = scmp.lt.s32.totalorder %s1697_s14, %s1697_s14 }
  0x22   : > { %p1700_p8 = pnand %p1698_p7, %p1686_p0  ;;  %p1707_p5 = por %p1706_p6, %p1705_p9 }
  0x24   : > { %p1701_p11 = pneg %p1700_p8 }
  0x26   : > { %p1708_p10 = pnand %p1707_p5, %p1701_p11 }
  0x28   : > { %1711 = shalt.err (!%p1708_p10)
}
  0x29   : > { %s1814_s20 = smov 64   ;;  %s1815_s22 = smov 4  }
  0x2a   : > { %1592 = dma.hbm_to_vmem [thread:$0]  (!%p1910_p12), %s2205_s1, 256, %s152_s29, [#allocation5], %s1814_s20, %s1814_s20, %s1815_s22  }
  0x2b   : > { %s1712_s8 = scalar_lea.hbm %s2207_s3, 512 }
  0x2c   : > { %p1713_p13 = scmp.ne.s32.totalorder %s2207_s3, %s1712_s8  ;;  %p1719_p9 = scmp.lt.u32.totalorder %s1712_s8, %s2207_s3 }
  0x2e   : > { %p1715_p5 = pnand %p1713_p13, %p1686_p0 }
  0x30   : > { %p1716_p6 = pneg %p1715_p5 }
  0x32   : > { %p1721_p10 = pnand %p1719_p9, %p1716_p6 }
  0x34   : > { %1724 = shalt.err (!%p1721_p10)
}
  0x35   : > { %s1725_s29 = scalar_lea.vmem %s1914_s6, 512  ;;  %p1733_p4 = scmp.lt.s32.totalorder %s1914_s6, %s1914_s6 }
  0x36   : > { %p1726_p1 = scmp.ne.s32.totalorder %s1914_s6, %s1725_s29  ;;  %p1734_p7 = scmp.lt.s32.totalorder %s1725_s29, %s1725_s29 }
  0x38   : > { %p1728_p2 = pnand %p1726_p1, %p1686_p0  ;;  %p1735_p8 = por %p1734_p7, %p1733_p4 }
  0x3a   : > { %p1729_p3 = pneg %p1728_p2 }
  0x3c   : > { %p1736_p11 = pnand %p1735_p8, %p1729_p3 }
  0x3e   : > { %1739 = shalt.err (!%p1736_p11)
}
  0x3f   : > { %s1816_s13 = smov 128   ;;  %s1817_s14 = smov 8  }
  0x40   : > { %1595 = dma.hbm_to_vmem [thread:$0]  (!%p1910_p12), %s2207_s3, 512, %s1914_s6, [#allocation8], %s1816_s13, %s1816_s13, %s1817_s14  }
  0x41   : > { %p2216_p13 = scmp.ne.s32.totalorder %s2214_s27, 0 }
  0x42   : > { %p2217_p0 = scmp.eq.s32.totalorder (!%p2216_p13), %s1874_s19, 0 }
  0x43   : > { %191 = sbr.rel (%p2216_p13) target bundleno = 1403 (0x57b), region = 36 }
  0x4a   : > { %1785 = dma.done.wait (%p2217_p0), [#allocation5], 256   ;;  %p2218_p5 = pmov %p2217_p0 }
  0x4b   : > { %p2219_p6 = pmov %p2217_p0 }
  0x4c   : > { %1787 = vsyncadd (%p2218_p5), [#allocation5], 4294967040 }
  0x4d   : > { %1789 = dma.done.wait (%p2219_p6), [#allocation8], 512   ;;  %p2220_p9 = pmov %p2217_p0 }
  0x4e   : > { %v1818_v0 = vmov 0   ;;  %s1819_s30 = smov 1   ;;  %s1820_s27 = smov 2   ;;  %v1658_v4 = vld [vmem:[#allocation4] sm:$0xff]   ;;  %vm330_vm0 = vcmask 654336   ;;  %v1988_v5 = vld [vmem:[%s2206_s2 + $0x8] sm:$0xff] }
  0x4f   : > { %1791 = vsyncadd (%p2220_p9), [#allocation8], 4294966784  ;;  %261 = vrot.lane.b32.xlu1 %v1818_v0, %s1819_s30  ;;  %249 = vrot.lane.b32.xlu0 %v1818_v0, %s1820_s27  ;;  %p221_p12 = scmp.lt.s32.totalorder %s1874_s19, 1  ;;  %s1821_s8 = smov 127   ;;  %v1993_v6 = vld [vmem:[%s2206_s2] sm:$0xff]  ;;  %v2000_v7 = vld [vmem:[%s2206_s2 + $0x10] sm:$0xff] }
  0x50   : > { %1653 = vset.pattern.permute.xlu1 %v1818_v0  ;;  %1652 = vset.pattern.permute.xlu0 %v1818_v0  ;;  %s1822_s9 = smov 126   ;;  %v2005_v8 = vld [vmem:[%s2206_s2 + $0x18] sm:$0xff]  ;;  %vm253_vm1 = vcmask 15360   ;;  %vm265_vm2 = vcmask 7168   ;;  %vm279_vm3 = vcmask 1039360   ;;  %vm291_vm4 = vcmask 1031168  }
  0x51   : > { %s222_s6 = scalar_select %p221_p12, %s1874_s19, 1  ;;  %1423 = vmatprep.mubr.msk.bf16.mxu0 %vm330_vm0, %v1658_v4  ;;  %v1659_v21 = vld [vmem:[#allocation4 + $0x8] sm:$0xff]   ;;  %v237_v38 = vld [vmem:[#allocation7] sm:$0xff]  ;;  %vm411_vm5 = vcmask 261120   ;;  %v238_v45 = vld [vmem:[#allocation7 + $0x8] sm:$0xff] }
  0x52   : > { %v413_v39 = vsel %vm411_vm5, %v237_v38, 0  ;;  %v416_v48 = vsel %vm411_vm5, %v238_v45, 0  ;;  %v239_v49 = vld [vmem:[#allocation7 + $0x10] sm:$0xff]  ;;  %v240_v54 = vld [vmem:[#allocation7 + $0x18] sm:$0xff]  ;;  %s1357_s28 = sshll.u32 %s1874_s19, 9  ;;  %p2221_p1 = scmp.ne.s32.totalorder %s2212_s25, 0 }
  0x53   : > { %s1356_s23 = sshll.u32 %s222_s6, 4  ;;  %v2032_v40 = vand.u32 4294901760, %v413_v39  ;;  %v2043_v51 = vand.u32 4294901760, %v416_v48  ;;  %v419_v53 = vsel %vm411_vm5, %v239_v49, 0  ;;  %v422_v58 = vsel %vm411_vm5, %v240_v54, 0  ;;  %s1825_s10 = smov [#allocation9]  }
  0x54   : > { %s225_s7 = scalar_lea.vmem %s2204_s0, %s1356_s23  ;;  %v2049_v57 = vand.u32 4294901760, %v419_v53  ;;  %s1744_s11 = sshll.u32 %s1825_s10, 4  ;;  %s1745_s11 = int_to_ptr.vmem [resolvable:$false] %s1744_s11 }
  0x55   : > { %v241_v1 = vld [vmem:[%s225_s7] sm:$0xff]  ;;  %v242_v2 = vld [vmem:[%s225_s7 + $0x8] sm:$0xff]  ;;  %v2035_v41 = vsub.f32 %v413_v39, %v2032_v40  ;;  %v2047_v56 = vsub.f32 %v416_v48, %v2043_v51  ;;  %s1746_s12 = scalar_lea.vmem %s1745_s11, 1024 }
  0x56   : > { %v243_v3 = vpack.c.bf16 %v242_v2, %v241_v1  ;;  %v2058_v4 = vsub.f32 %v419_v53, %v2049_v57 }
  0x57   : > { %v495_v42 = vand.u32 4294901760, %v2035_v41  ;;  %1463 = vmatprep.mubr.f32.mxu1 %v2035_v41 }
  0x58   : > { %263 = vrot.lane.b32.xlu1 %v243_v3, %s1819_s30  ;;  %251 = vrot.lane.b32.xlu0 %v243_v3, %s1820_s27 }
  0x59   : > { %v496_v43 = vsub.f32 %v2035_v41, %v495_v42 }
  0x5b   : > { %v497_v44 = vand.u32 4294901760, %v496_v43 }
  0x5c   : > { %277 = vrot.lane.b32.xlu1 %v1818_v0, %s1821_s8  ;;  %275 = vrot.lane.b32.xlu0 %v243_v3, %s1821_s8 }
  0x60   : > { %289 = vrot.lane.b32.xlu1 %v1818_v0, %s1822_s9  ;;  %287 = vrot.lane.b32.xlu0 %v243_v3, %s1822_s9  ;;  %v2054_v0 = vand.u32 4294901760, %v422_v58 }
  0x64   : > { %307 = vperm.xlu1 %1653, %v1988_v5   ;;  %302 = vperm.xlu0 %1652, %v1993_v6  }
  0x68   : > { %312 = vperm.xlu1 %1653, %v2000_v7   ;;  %317 = vperm.xlu0 %1652, %v2005_v8  }
  0xc1   : > { %v262_v9 = vpop.permute.xlu1 %261  ;;  %v250_v10 = vpop.permute.xlu0 %249 }
  0xca   : > { %v264_v11 = vpop.permute.xlu1 %263  ;;  %v252_v12 = vpop.permute.xlu0 %251 }
  0xcb   : > { %v254_v13 = vsel %vm253_vm1, %v250_v10, %v252_v12  ;;  %v266_v14 = vsel %vm265_vm2, %v262_v9, %v264_v11 }
  0xcc   : > { %1413 = vmatprep.subr.bf16.mxu0 %v254_v13 }
  0xcd   : > { %1414 = vmatpush3.bf16.msra.mxu0 %v254_v13 }
  0xce   : > { %1415 = vmatprep.subr.bf16.mxu0 %v266_v14  ;;  %v278_v15 = vpop.permute.xlu1 %277  ;;  %v276_v16 = vpop.permute.xlu0 %275 }
  0xcf   : > { %v280_v17 = vsel %vm279_vm3, %v276_v16, %v278_v15 }
  0xd1   : > { %1416 = vmatpush3.bf16.msra.mxu0 %v266_v14 }
  0xd2   : > { %1417 = vmatprep.subr.bf16.mxu0 %v243_v3  ;;  %v290_v18 = vpop.permute.xlu1 %289  ;;  %v288_v19 = vpop.permute.xlu0 %287 }
  0xd3   : > { %v292_v20 = vsel %vm291_vm4, %v288_v19, %v290_v18  ;;  %v524_v19 = vsub.f32 %v422_v58, %v2054_v0 }
  0xd5   : > { %1418 = vmatpush3.bf16.msra.mxu0 %v243_v3  ;;  %v505_v3 = vand.u32 4294901760, %v2047_v56 }
  0xd6   : > { %1419 = vmatprep.subr.bf16.mxu0 %v280_v17 }
  0xd9   : > { %1420 = vmatpush3.bf16.msra.mxu0 %v280_v17 }
  0xda   : > { %1421 = vmatprep.subr.bf16.mxu0 %v292_v20 }
  0xdd   : > { %1422 = vmatpush3.bf16.msra.mxu0 %v292_v20 }
  0xe0   : > { %1424 = vmatmul.mubr.msk.bf16.vlgmr.msra.gmra.mrb[0].mxu0 %vm330_vm0, %v1659_v21 }
  0xe1   : > { %1435 = vmatprep.mubr.f32.mxu0 %v497_v44 }
  0xe3   : > { %v308_v22 = vpop.permute.xlu1 %307  ;;  %v303_v23 = vpop.permute.xlu0 %302 }
  0xe7   : > { %v313_v24 = vpop.permute.xlu1 %312  ;;  %v318_v30 = vpop.permute.xlu0 %317 }
 0x1b3   : > { %v1425_v25 = vpop.f32.mrb[0].mxu0 }
 0x1b4   : > { %v2011_v26 = vadd.f32 %v1425_v25, %v313_v24  ;;  %v371_v27 = vpop.f32.mrb[1].mxu0 }
 0x1b5   : > { %v2013_v28 = vadd.f32 %v371_v27, %v303_v23  ;;  %v1426_v29 = vpop.f32.mrb[2].mxu0  ;;  %v515_v23 = vand.u32 4294901760, %v2058_v4 }
 0x1b6   : > { %390 = vadd.xlane.f32.xlu0 %v2011_v26  ;;  %v374_v31 = vpop.f32.mrb[3].mxu0  ;;  %v2019_v33 = vadd.f32 %v1426_v29, %v318_v30  ;;  %v396_v36 = vmul.f32 %v2011_v26, %v2011_v26 }
 0x1b7   : > { %v2016_v32 = vadd.f32 %v374_v31, %v308_v22  ;;  %386 = vadd.xlane.f32.xlu1 %v2013_v28  ;;  %v394_v34 = vmul.f32 %v2013_v28, %v2013_v28  ;;  %v506_v22 = vsub.f32 %v2047_v56, %v505_v3  ;;  %v516_v39 = vsub.f32 %v2058_v4, %v515_v23 }
 0x1b8   : > { %v397_v37 = vmul.f32 %v2019_v33, %v2019_v33 }
 0x1b9   : > { %v395_v35 = vmul.f32 %v2016_v32, %v2016_v32  ;;  %v517_v48 = vand.u32 4294901760, %v516_v39 }
 0x1ba   : > { %388 = vadd.xlane.f32.xlu0 %v2016_v32 }
 0x1bb   : > { %392 = vadd.xlane.f32.xlu1 %v2019_v33 }
 0x1be   : > { %398 = vadd.xlane.f32.xlu0 %v394_v34 }
 0x1bf   : > { %400 = vadd.xlane.f32.xlu1 %v395_v35 }
 0x1c2   : > { %402 = vadd.xlane.f32.xlu0 %v396_v36  ;;  %v525_v36 = vand.u32 4294901760, %v524_v19 }
 0x1c3   : > { %404 = vadd.xlane.f32.xlu1 %v397_v37  ;;  %v507_v37 = vand.u32 4294901760, %v506_v22 }
 0x243   : > { %v391_v46 = vpop.xlane.xlu0 %390 }
 0x244   : > { %v387_v47 = vpop.xlane.xlu1 %386 }
 0x247   : > { %v389_v50 = vpop.xlane.xlu0 %388 }
 0x248   : > { %v393_v52 = vpop.xlane.xlu1 %392 }
 0x24b   : > { %v399_v55 = vpop.xlane.xlu0 %398 }
 0x24c   : > { %v407_v59 = vsel %vm265_vm2, %v387_v47, %v399_v55  ;;  %v401_v60 = vpop.xlane.xlu1 %400  ;;  %v526_v47 = vsub.f32 %v524_v19, %v525_v36 }
 0x24d   : > { %v425_v61 = vand.u32 4294901760, %v407_v59  ;;  %v408_v62 = vsel %vm265_vm2, %v389_v50, %v401_v60 }
 0x24e   : > { %v428_v63 = vand.u32 4294901760, %v408_v62  ;;  %v527_v50 = vand.u32 4294901760, %v526_v47 }
 0x24f   : > { %v535_v1 = vsub.f32 %v407_v59, %v425_v61  ;;  %v403_v2 = vpop.xlane.xlu0 %402 }
 0x250   : > { %v2060_v9 = vpack.c.bf16 %v428_v63, %v425_v61  ;;  %v542_v10 = vsub.f32 %v408_v62, %v428_v63  ;;  %v409_v11 = vsel %vm265_vm2, %v391_v46, %v403_v2  ;;  %v405_v12 = vpop.xlane.xlu1 %404 }
 0x251   : > { %v536_v13 = vand.u32 4294901760, %v535_v1  ;;  %v431_v14 = vand.u32 4294901760, %v409_v11  ;;  %v410_v15 = vsel %vm265_vm2, %v393_v52, %v405_v12 }
 0x252   : > { %v543_v16 = vand.u32 4294901760, %v542_v10  ;;  %v434_v17 = vand.u32 4294901760, %v410_v15  ;;  %1512 = vmatprep.subr.bf16.mxu0 %v2060_v9  ;;  %v1527_v18 = vpack.c.bf16 %v542_v10, %v535_v1 }
 0x253   : > { %v549_v20 = vsub.f32 %v409_v11, %v431_v14  ;;  %1514 = vmatpush3.bf16.msra.mxu0 %v2060_v9  ;;  %v537_v21 = vsub.f32 %v535_v1, %v536_v13 }
 0x254   : > { %v1515_v24 = vpack.c.bf16 %v434_v17, %v431_v14  ;;  %v556_v25 = vsub.f32 %v410_v15, %v434_v17  ;;  %1528 = vmatprep.subr.bf16.mxu1 %v1527_v18  ;;  %v544_v27 = vsub.f32 %v542_v10, %v543_v16  ;;  %v1543_v52 = vpack.c.bf16 %v543_v16, %v536_v13 }
 0x255   : > { %v550_v29 = vand.u32 4294901760, %v549_v20  ;;  %1530 = vmatpush3.bf16.msra.mxu1 %v1527_v18  ;;  %v538_v30 = vand.u32 4294901760, %v537_v21 }
 0x256   : > { %v557_v31 = vand.u32 4294901760, %v556_v25  ;;  %1516 = vmatprep.subr.bf16.mxu0 %v1515_v24  ;;  %v1531_v34 = vpack.c.bf16 %v556_v25, %v549_v20  ;;  %v545_v35 = vand.u32 4294901760, %v544_v27  ;;  %v1823_v27 = vmov 1  }
 0x257   : > { %1518 = vmatpush3.bf16.msra.mxu0 %v1515_v24  ;;  %v551_v38 = vsub.f32 %v549_v20, %v550_v29  ;;  %1654 = vset.pattern.permute.xlu1 %v1823_v27 }
 0x258   : > { %1532 = vmatprep.subr.bf16.mxu1 %v1531_v34  ;;  %v1519_v43 = vpack.c.bf16 %v545_v35, %v538_v30  ;;  %v558_v44 = vsub.f32 %v556_v25, %v557_v31  ;;  %v1547_v53 = vpack.c.bf16 %v557_v31, %v550_v29  ;;  %1655 = vset.pattern.permute.xlu0 %v1823_v27 }
 0x259   : > { %1534 = vmatpush3.bf16.msra.mxu1 %v1531_v34  ;;  %v552_v45 = vand.u32 4294901760, %v551_v38 }
 0x25a   : > { %1520 = vmatprep.subr.bf16.mxu0 %v1519_v43  ;;  %1536 = vmatprep.subr.bf16.mxu1 %v2060_v9  ;;  %v559_v46 = vand.u32 4294901760, %v558_v44 }
 0x25b   : > { %1436 = vmatmul.mubr.f32.vlgmr.msra.gmra.mrb[4].mxu0 %v507_v37 }
 0x25c   : > { %1522 = vmatpush3.bf16.msra.mxu0 %v1519_v43  ;;  %1464 = vmatmul.mubr.f32.vlgmr.msra.gmra.mrb[0].mxu1 %v2047_v56  ;;  %v1523_v49 = vpack.c.bf16 %v559_v46, %v552_v45 }
 0x25d   : > { %1538 = vmatpush3.bf16.msra.mxu1 %v2060_v9  ;;  %1466 = vmatprep.mubr.f32.mxu1 %v2058_v4 }
 0x25e   : > { %1524 = vmatprep.subr.bf16.mxu0 %v1523_v49  ;;  %1540 = vmatprep.subr.bf16.mxu1 %v1515_v24 }
 0x25f   : > { %1438 = vmatprep.mubr.f32.mxu0 %v517_v48 }
 0x260   : > { %1526 = vmatpush3.bf16.msra.mxu0 %v1523_v49  ;;  %1467 = vmatmul.mubr.f32.gmra.mrb[2].mxu1 %v524_v19 }
 0x261   : > { %1542 = vmatpush3.bf16.msra.mxu1 %v1515_v24  ;;  %1477 = vmatprep.mubr.f32.mxu1 %v495_v42 }
 0x262   : > { %1544 = vmatprep.subr.bf16.mxu1 %v1543_v52  ;;  %1439 = vmatmul.mubr.f32.gmra.mrb[6].mxu0 %v527_v50  ;;  %v1824_v50 = vmov 2  }
 0x263   : > { %1449 = vmatprep.mubr.f32.mxu0 %v2032_v40 }
 0x264   : > { %1478 = vmatmul.mubr.f32.vlgmr.msra.gmra.mrb[0].mxu1 %v505_v3 }
 0x265   : > { %1546 = vmatpush3.bf16.msra.mxu1 %v1543_v52  ;;  %1480 = vmatprep.mubr.f32.mxu1 %v515_v23 }
 0x266   : > { %1548 = vmatprep.subr.bf16.mxu1 %v1547_v53  ;;  %1450 = vmatmul.mubr.f32.vlgmr.msra.gmra.mrb[4].mxu0 %v2043_v51 }
 0x267   : > { %1452 = vmatprep.mubr.f32.mxu0 %v2049_v57 }
 0x268   : > { %1481 = vmatmul.mubr.f32.gmra.mrb[2].mxu1 %v525_v36 }
 0x269   : > { %1550 = vmatpush3.bf16.msra.mxu1 %v1547_v53  ;;  %1491 = vmatprep.mubr.f32.mxu1 %v2032_v40 }
 0x26a   : > { %1552 = vmatprep.subr.bf16.mxu1 %v2060_v9  ;;  %1453 = vmatmul.mubr.f32.gmra.mrb[6].mxu0 %v2054_v0 }
 0x26c   : > { %1492 = vmatmul.mubr.f32.vlgmr.msra.gmra.mrb[0].mxu1 %v2043_v51 }
 0x26d   : > { %1554 = vmatpush3.bf16.msra.mxu1 %v2060_v9  ;;  %1494 = vmatprep.mubr.f32.mxu1 %v2049_v57 }
 0x26e   : > { %1556 = vmatprep.subr.bf16.mxu1 %v1515_v24 }
 0x270   : > { %1495 = vmatmul.mubr.f32.gmra.mrb[2].mxu1 %v2054_v0 }
 0x271   : > { %1558 = vmatpush3.bf16.msra.mxu1 %v1515_v24  ;;  %1505 = vmatprep.mubr.f32.mxu1 %v2032_v40 }
 0x274   : > { %1506 = vmatmul.mubr.f32.vlgmr.msra.gmra.mrb[0].mxu1 %v2043_v51 }
 0x275   : > { %1508 = vmatprep.mubr.f32.mxu1 %v2049_v57 }
 0x278   : > { %1509 = vmatmul.mubr.f32.gmra.mrb[2].mxu1 %v2054_v0 }
 0x339   : > { %v1451_v41 = vpop.f32.mrb[4].mxu0 }
 0x33a   : > { %v620_v42 = vpop.f32.mrb[5].mxu0 }
 0x33d   : > { %v1454_v54 = vpop.f32.mrb[6].mxu0 }
 0x33e   : > { %v632_v55 = vpop.f32.mrb[7].mxu0 }
 0x347   : > { %v1507_v56 = vpop.f32.mrb[0].mxu1 }
 0x348   : > { %v1559_v58 = vadd.f32 %v1507_v56, %v1451_v41  ;;  %v1016_v59 = vpop.f32.mrb[1].mxu1 }
 0x349   : > { %v1560_v60 = vadd.f32 %v1016_v59, %v620_v42 }
 0x34a   : > { %v1039_v61 = vmul.f32 0.001953125, %v1559_v58 }
 0x34b   : > { %v1038_v62 = vmul.f32 0.001953125, %v1560_v60  ;;  %v1510_v63 = vpop.f32.mrb[2].mxu1 }
 0x34c   : > { %v1561_v1 = vadd.f32 %v1510_v63, %v1454_v54  ;;  %v1028_v2 = vpop.f32.mrb[3].mxu1  ;;  %v1043_v40 = vmul.f32 %v1039_v61, %v1039_v61 }
 0x34d   : > { %v1562_v3 = vadd.f32 %v1028_v2, %v632_v55  ;;  %v1042_v51 = vmul.f32 %v1038_v62, %v1038_v62 }
 0x34e   : > { %v1041_v4 = vmul.f32 0.001953125, %v1561_v1  ;;  %1052 = vrot.lane.b32.xlu1 %v1043_v40, %s1819_s30 }
 0x34f   : > { %v1040_v57 = vmul.f32 0.001953125, %v1562_v3  ;;  %1050 = vrot.lane.b32.xlu0 %v1042_v51, %s1819_s30 }
 0x350   : > { %v1045_v0 = vmul.f32 %v1041_v4, %v1041_v4 }
 0x351   : > { %v1044_v9 = vmul.f32 %v1040_v57, %v1040_v57 }
 0x353   : > { %1056 = vrot.lane.b32.xlu0 %v1045_v0, %s1819_s30  ;;  %1054 = vrot.lane.b32.xlu1 %v1044_v9, %s1819_s30  ;;  %s218_s30 = sand.u32 1, %s1802_s16  }
 0x354   : > { %s2163_s19 = scalar_lea.sflag [#allocation6], %s218_s30 }
 0x3c0   : > { %v1053_v10 = vpop.permute.xlu1 %1052 }
 0x3c1   : > { %v1063_v11 = vsub.f32 %v1039_v61, %v1053_v10  ;;  %v1051_v12 = vpop.permute.xlu0 %1050 }
 0x3c2   : > { %v1062_v13 = vsub.f32 %v1038_v62, %v1051_v12 }
 0x3c3   : > { %v1067_v14 = vmax.f32 %v1063_v11, 0.0 }
 0x3c4   : > { %v1066_v15 = vmax.f32 %v1062_v13, 0.0 }
 0x3c5   : > { %v1071_v16 = vadd.f32 1e-05, %v1067_v14  ;;  %v1057_v17 = vpop.permute.xlu0 %1056  ;;  %v1055_v18 = vpop.permute.xlu1 %1054 }
 0x3c6   : > { %v1070_v19 = vadd.f32 1e-05, %v1066_v15  ;;  %v1065_v20 = vsub.f32 %v1041_v4, %v1057_v17  ;;  %v1064_v21 = vsub.f32 %v1040_v57, %v1055_v18 }
 0x3c7   : > { %1660 = vrsqrt.f32 %v1071_v16 }
 0x3c8   : > { %1662 = vrsqrt.f32 %v1070_v19  ;;  %v1069_v22 = vmax.f32 %v1065_v20, 0.0  ;;  %v1068_v23 = vmax.f32 %v1064_v21, 0.0 }
 0x3ca   : > { %v1073_v24 = vadd.f32 1e-05, %v1069_v22  ;;  %v1072_v25 = vadd.f32 1e-05, %v1068_v23 }
 0x3cc   : > { %1664 = vrsqrt.f32 %v1073_v24 }
 0x3cd   : > { %1666 = vrsqrt.f32 %v1072_v25 }
 0x3d1   : > { %v1661_v29 = vpop.eup %1660 }
 0x3d2   : > { %v1663_v30 = vpop.eup %1662  ;;  %v1079_v31 = vmul.f32 %v1661_v29, %v1988_v5 }
 0x3d3   : > { %v1078_v34 = vmul.f32 %v1663_v30, %v1993_v6 }
 0x3d4   : > { %1088 = vrot.lane.b32.xlu0 %v1079_v31, %s1821_s8 }
 0x3d5   : > { %1086 = vrot.lane.b32.xlu1 %v1078_v34, %s1821_s8 }
 0x3d6   : > { %v1665_v35 = vpop.eup %1664 }
 0x3d7   : > { %v1667_v36 = vpop.eup %1666  ;;  %v1081_v37 = vmul.f32 %v1665_v35, %v2005_v8 }
 0x3d8   : > { %v1080_v38 = vmul.f32 %v1667_v36, %v2000_v7 }
 0x3d9   : > { %1092 = vrot.lane.b32.xlu0 %v1081_v37, %s1821_s8 }
 0x3da   : > { %1090 = vrot.lane.b32.xlu1 %v1080_v38, %s1821_s8  ;;  %s2159_s8 = scalar_lea.hbm %s2208_s4, %s1357_s28 }
 0x446   : > { %v1089_v39 = vpop.permute.xlu0 %1088 }
 0x447   : > { %v1099_v43 = vmul.f32 %v1089_v39, %v1039_v61  ;;  %v1087_v44 = vpop.permute.xlu1 %1086 }
 0x448   : > { %v1098_v45 = vmul.f32 %v1087_v44, %v1038_v62 }
 0x449   : > { %1108 = vrot.lane.b32.xlu0 %v1099_v43, %s1820_s27 }
 0x44a   : > { %1106 = vrot.lane.b32.xlu1 %v1098_v45, %s1820_s27 }
 0x44b   : > { %v1093_v46 = vpop.permute.xlu0 %1092 }
 0x44c   : > { %v1101_v47 = vmul.f32 %v1093_v46, %v1041_v4  ;;  %v1091_v48 = vpop.permute.xlu1 %1090 }
 0x44d   : > { %v1100_v49 = vmul.f32 %v1091_v48, %v1040_v57 }
 0x44e   : > { %1112 = vrot.lane.b32.xlu0 %v1101_v47, %s1820_s27 }
 0x44f   : > { %1110 = vrot.lane.b32.xlu1 %v1100_v49, %s1820_s27  ;;  %s1344_s27 = sshll.u32 %s218_s30, 5 }
 0x450   : > { %s220_s6 = scalar_lea.vmem [#allocation9], %s1344_s27 }
 0x451   : > { %s1252_s23 = sshll.u32 %s220_s6, 4  ;;  %s2154_s23 = int_to_ptr.vmem [resolvable:$true] %s1252_s23 }
 0x452   : > { %1127 = vperm.xlu0 %1655, %v1079_v31   ;;  %s1740_s9 = scalar_lea.vmem %s2154_s23, 512  ;;  %p1747_p4 = scmp.lt.s32.totalorder %s2154_s23, %s1745_s11 }
 0x453   : > { %1123 = vperm.xlu1 %1654, %v1078_v34   ;;  %p1741_p10 = scmp.ne.s32.totalorder %s2154_s23, %s1740_s9  ;;  %p1748_p7 = scmp.lt.s32.totalorder %s1746_s12, %s1740_s9 }
 0x455   : > { %p1742_p2 = pnand %p1741_p10, %p2221_p1  ;;  %p1749_p8 = por %p1748_p7, %p1747_p4 }
 0x456   : > { %1657 = vset.pattern.permute.xlu0 %v1824_v50 }
 0x457   : > { %1131 = vperm.xlu1 %1654, %v1080_v38   ;;  %p1743_p3 = pneg %p1742_p2 }
 0x459   : > { %p1750_p11 = pnand %p1749_p8, %p1743_p3 }
 0x45b   : > { %1135 = vperm.xlu1 %1654, %v1081_v37  }
 0x45f   : > { %1656 = vset.pattern.permute.xlu1 %v1824_v50 }
 0x4bb   : > { %v1109_v52 = vpop.permute.xlu0 %1108 }
 0x4bc   : > { %v1119_v53 = vsub.f32 %v1988_v5, %v1109_v52  ;;  %v1107_v41 = vpop.permute.xlu1 %1106 }
 0x4bd   : > { %v1118_v42 = vsub.f32 %v1993_v6, %v1107_v41 }
 0x4be   : > { %1149 = vperm.xlu1 %1656, %v1119_v53  }
 0x4bf   : > { %1144 = vperm.xlu0 %1657, %v1118_v42  }
 0x4c0   : > { %v1113_v54 = vpop.permute.xlu0 %1112 }
 0x4c1   : > { %v1121_v55 = vsub.f32 %v2005_v8, %v1113_v54  ;;  %v1111_v56 = vpop.permute.xlu1 %1110 }
 0x4c2   : > { %v1120_v58 = vsub.f32 %v2000_v7, %v1111_v56 }
 0x4c3   : > { %1159 = vperm.xlu0 %1657, %v1121_v55  }
 0x4c4   : > { %1154 = vperm.xlu1 %1656, %v1120_v58  }
 0x4d1   : > { %v1128_v61 = vpop.permute.xlu0 %1127 }
 0x4d2   : > { %v1124_v59 = vpop.permute.xlu1 %1123  ;;  %v1139_v63 = vmul.f32 %v1128_v61, %v2016_v32 }
 0x4d3   : > { %v1138_v5 = vmul.f32 %v1124_v59, %v2013_v28 }
 0x4d6   : > { %v1132_v60 = vpop.permute.xlu1 %1131 }
 0x4d7   : > { %v1140_v51 = vmul.f32 %v1132_v60, %v2011_v26 }
 0x4da   : > { %v1136_v62 = vpop.permute.xlu1 %1135 }
 0x4db   : > { %v1141_v7 = vmul.f32 %v1136_v62, %v2019_v33 }
 0x53d   : > { %v1150_v1 = vpop.permute.xlu1 %1149 }
 0x53e   : > { %v2112_v6 = vadd.f32 %v1150_v1, %v1139_v63  ;;  %v1145_v2 = vpop.permute.xlu0 %1144 }
 0x53f   : > { %v2114_v40 = vadd.f32 %v1145_v2, %v1138_v5 }
 0x540   : > { %v1167_v8 = vand.u32 2147483647, %v2112_v6  ;;  %vm1183_vm6 = vcmp.ge.f32.partialorder %v2112_v6, 0.0 }
 0x541   : > { %v1166_v3 = vand.u32 2147483647, %v2114_v40  ;;  %vm1182_vm7 = vcmp.ge.f32.partialorder %v2114_v40, 0.0 }
 0x542   : > { %v1171_v4 = vsub.f32 0.0, %v1167_v8  ;;  %v1160_v57 = vpop.permute.xlu0 %1159 }
 0x543   : > { %v1170_v0 = vsub.f32 0.0, %v1166_v3  ;;  %v2120_v32 = vadd.f32 %v1160_v57, %v1141_v7  ;;  %v1155_v28 = vpop.permute.xlu1 %1154 }
 0x544   : > { %v1176_v9 = vmul.f32 1.442695, %v1171_v4  ;;  %v2122_v10 = vadd.f32 %v1155_v28, %v1140_v51 }
 0x545   : > { %v1174_v11 = vmul.f32 1.442695, %v1170_v0  ;;  %v1169_v12 = vand.u32 2147483647, %v2120_v32  ;;  %vm1185_vm8 = vcmp.ge.f32.partialorder %v2120_v32, 0.0 }
 0x546   : > { %1668 = vpow2.f32 %v1176_v9  ;;  %v1168_v13 = vand.u32 2147483647, %v2122_v10  ;;  %vm1184_vm9 = vcmp.ge.f32.partialorder %v2122_v10, 0.0 }
 0x547   : > { %1670 = vpow2.f32 %v1174_v11  ;;  %v1173_v33 = vsub.f32 0.0, %v1169_v12 }
 0x548   : > { %v1172_v14 = vsub.f32 0.0, %v1168_v13 }
 0x549   : > { %v1180_v15 = vmul.f32 1.442695, %v1173_v33 }
 0x54a   : > { %v1178_v26 = vmul.f32 1.442695, %v1172_v14 }
 0x54b   : > { %1672 = vpow2.f32 %v1180_v15 }
 0x54c   : > { %1674 = vpow2.f32 %v1178_v26 }
 0x550   : > { %v1669_v16 = vpop.eup %1668 }
 0x551   : > { %v1671_v17 = vpop.eup %1670  ;;  %v1187_v18 = vmul.f32 2.0, %v1669_v16  ;;  %v1195_v19 = vadd.f32 2.0, %v1669_v16 }
 0x552   : > { %v1186_v20 = vmul.f32 2.0, %v1671_v17  ;;  %v1194_v21 = vadd.f32 2.0, %v1671_v17 }
 0x553   : > { %v1191_v22 = vadd.f32 1.0, %v1187_v18  ;;  %v1199_v23 = vmul.f32 %v1669_v16, %v1195_v19  ;;  %v1207_v24 = vmul.f32 %v1669_v16, %v1187_v18 }
 0x554   : > { %v1190_v25 = vadd.f32 1.0, %v1186_v20  ;;  %v1198_v27 = vmul.f32 %v1671_v17, %v1194_v21  ;;  %v1206_v29 = vmul.f32 %v1671_v17, %v1186_v20 }
 0x555   : > { %v1673_v30 = vpop.eup %1672  ;;  %v1211_v31 = vadd.f32 %v1207_v24, %v1191_v22  ;;  %v1215_v34 = vadd.f32 2.0, %v1199_v23  ;;  %v1203_v58 = vsel %vm1183_vm6, %v1191_v22, %v1199_v23 }
 0x556   : > { %v1675_v35 = vpop.eup %1674  ;;  %v1210_v36 = vadd.f32 %v1206_v29, %v1190_v25  ;;  %v1214_v37 = vadd.f32 2.0, %v1198_v27  ;;  %v1189_v39 = vmul.f32 2.0, %v1673_v30  ;;  %v1197_v43 = vadd.f32 2.0, %v1673_v30 }
 0x557   : > { %v1219_v38 = vsel %vm1183_vm6, %v1211_v31, %v1215_v34  ;;  %v1188_v45 = vmul.f32 2.0, %v1675_v35  ;;  %v1196_v46 = vadd.f32 2.0, %v1675_v35  ;;  %v1202_v60 = vsel %vm1182_vm7, %v1190_v25, %v1198_v27 }
 0x558   : > { %1676 = vrcp.f32 %v1219_v38  ;;  %v1218_v44 = vsel %vm1182_vm7, %v1210_v36, %v1214_v37  ;;  %v1193_v47 = vadd.f32 1.0, %v1189_v39  ;;  %v1201_v48 = vmul.f32 %v1673_v30, %v1197_v43 }
 0x559   : > { %1678 = vrcp.f32 %v1218_v44  ;;  %v1209_v49 = vmul.f32 %v1673_v30, %v1189_v39  ;;  %v1192_v50 = vadd.f32 1.0, %v1188_v45  ;;  %v1200_v52 = vmul.f32 %v1675_v35, %v1196_v46 }
 0x55a   : > { %v1208_v53 = vmul.f32 %v1675_v35, %v1188_v45  ;;  %v1217_v42 = vadd.f32 2.0, %v1201_v48  ;;  %v1223_v61 = vmul.f32 %v1203_v58, %v2112_v6  ;;  %v1222_v63 = vmul.f32 %v1202_v60, %v2114_v40 }
 0x55b   : > { %v1213_v41 = vadd.f32 %v1209_v49, %v1193_v47  ;;  %v1216_v55 = vadd.f32 2.0, %v1200_v52  ;;  %v1205_v8 = vsel %vm1185_vm8, %v1193_v47, %v1201_v48  ;;  %v1204_v7 = vsel %vm1184_vm9, %v1192_v50, %v1200_v52 }
 0x55c   : > { %v1212_v54 = vadd.f32 %v1208_v53, %v1192_v50  ;;  %v1225_v6 = vmul.f32 %v1205_v8, %v2120_v32  ;;  %v1224_v40 = vmul.f32 %v1204_v7, %v2122_v10 }
 0x55d   : > { %v1221_v56 = vsel %vm1185_vm8, %v1213_v41, %v1217_v42 }
 0x55e   : > { %1680 = vrcp.f32 %v1221_v56  ;;  %v1220_v59 = vsel %vm1184_vm9, %v1212_v54, %v1216_v55 }
 0x55f   : > { %1682 = vrcp.f32 %v1220_v59 }
 0x562   : > { %v1677_v62 = vpop.eup %1676 }
 0x563   : > { %v1679_v5 = vpop.eup %1678  ;;  %v1231_v1 = vmul.f32 %v1677_v62, %v1223_v61 }
 0x564   : > { %v1230_v2 = vmul.f32 %v1679_v5, %v1222_v63 }
 0x565   : > { %1235 = vst [vmem:[%s220_s6 + $0x8] sm:$0xff] %v1231_v1 }
 0x566   : > { %1234 = vst [vmem:[%s220_s6] sm:$0xff] %v1230_v2 }
 0x568   : > { %v1681_v3 = vpop.eup %1680 }
 0x569   : > { %v1683_v51 = vpop.eup %1682  ;;  %v1233_v4 = vmul.f32 %v1681_v3, %v1225_v6 }
 0x56a   : > { %v1232_v57 = vmul.f32 %v1683_v51, %v1224_v40 }
 0x56b   : > { %1237 = vst [vmem:[%s220_s6 + $0x18] sm:$0xff] %v1233_v4 }
 0x56c   : > { %1236 = vst [vmem:[%s220_s6 + $0x10] sm:$0xff] %v1232_v57 }
 0x56d   : > { %1753 = shalt.err (!%p1750_p11)
}
 0x56e   : > { %s1754_s29 = scalar_lea.hbm %s2159_s8, 512  ;;  %s1758_s20 = scalar_lea.hbm %s2208_s4, 1024 }
 0x56f   : > { %p1755_p13 = scmp.ne.s32.totalorder %s2159_s8, %s1754_s29  ;;  %p1759_p6 = scmp.lt.u32.totalorder %s2159_s8, %s2208_s4 }
 0x570   : > { %p1760_p9 = scmp.lt.u32.totalorder %s1758_s20, %s1754_s29  ;;  %p1762_p10 = scmp.lt.u32.totalorder %s1754_s29, %s2159_s8 }
 0x571   : > { %p1756_p0 = pnand %p1755_p13, %p2221_p1 }
 0x572   : > { %p1761_p12 = por %p1760_p9, %p1759_p6 }
 0x573   : > { %p1757_p5 = pneg %p1756_p0 }
 0x574   : > { %p1763_p2 = por %p1762_p10, %p1761_p12 }
 0x576   : > { %p1764_p3 = pnand %p1763_p2, %p1757_p5 }
 0x578   : > { %1767 = shalt.err (!%p1764_p3)
}
 0x579   : > { %s1826_s27 = smov 128   ;;  %s1827_s6 = smov 8  }
 0x57a   : > { %1587 = dma.vmem_to_hbm [thread:$0]  (%p2221_p1), %s2154_s23, 512, %s2159_s8, %s2163_s19, %s1826_s27, %s1826_s27, %s1827_s6  }
 0x57b PF: > { %p1604_p4 = scmp.ge.s32.totalorder %s1810_s18, 2  ;;  %s1267_s28 = sand.u32 1, %s1798_s15  }
 0x57c   : > { %p2222_p7 = scmp.ne.s32.totalorder %s2213_s26, 0  ;;  %s1268_s5 = scalar_lea.sflag [#allocation6], %s1267_s28 }
 0x57e   : > { %p1597_p8 = pnand %p1604_p4, %p2222_p7 }
 0x580   : > { %1793 = dma.done.wait (!%p1597_p8), %s1268_s5, 512  }
 0x581   : > { %1795 = vsyncadd (!%p1597_p8), %s1268_s5, 4294966784  ;;  %p16_p11 = scmp.ge.s32.totalorder %s1878_s21, 4   ;;  %s2223_s15 = smov %s1802_s16 }
 0x582   : > { %s2224_s16 = smov %s1806_s17  ;;  %s2225_s17 = smov %s1889_s24 }
 0x583   : > { %s2226_s18 = smov %s1878_s21  ;;  %18 = sbr.rel (!%p16_p11) target bundleno = 5 (0x5), region = 80 }
 0x58a   :  { %1273 = vsyncpa [#allocation5], 1 }
 0x58b   :  { %1275 = vsyncpa [#allocation5 + $0x1], 1 }
 0x58c   :  { %1276 = vsyncpa [#allocation8], 1 }
 0x58d   :  { %1277 = vsyncpa [#allocation6], 1 }
 0x58e   :  { %1279 = vsyncpa [#allocation6 + $0x1], 1 }

</bundles_post_ra>
